<compile_context>
chip_gen: v7x
topology: tpu7x:2x2x1
jax: 0.10.0
libtpu: 0.0.40
codegen_flags: <defaults>
</compile_context>

<pallas_src>
import functools

import jax
import jax.numpy as jnp
from jax.experimental import pallas as pl
from jax.experimental.pallas import tpu as pltpu


def _bn_add_kernel(x_ref, r_ref, gamma_ref, beta_ref, o_ref, *, eps, inv_count):
    # x_ref, r_ref, o_ref : (N, block_c, HW)    gamma_ref, beta_ref : (1, block_c, 1)
    x = x_ref[...].astype(jnp.float32)

    # Single-pass per-channel batch statistics, accumulated in f32.
    s = jnp.sum(jnp.sum(x, axis=2, keepdims=True), axis=0, keepdims=True)
    sq = jnp.sum(jnp.sum(x * x, axis=2, keepdims=True), axis=0, keepdims=True)
    mean = s * inv_count
    # Clamp: E[x^2] - E[x]^2 can dip slightly negative from cancellation.
    var = jnp.maximum(sq * inv_count - mean * mean, 0.0)

    a = gamma_ref[...] * jax.lax.rsqrt(var + eps)    # (1, block_c, 1)
    b = beta_ref[...] - mean * a                     # (1, block_c, 1)

    # Single fused pass over the slab: normalize + affine + residual add.
    o_ref[...] = (x * a + b + r_ref[...].astype(jnp.float32)).astype(o_ref.dtype)


def _pick_block_c(C):
    """One grid step on single-TC chips; two balanced blocks on v7x (2 TCs)."""
    kind = ""
    try:
        kind = (jax.devices()[0].device_kind or "").lower()
    except Exception:
        pass
    two_cores = ("v7" in kind) or ("7x" in kind)
    if two_cores and C > 8:
        half = -(-C // 2)            # ceil(C / 2)
        bc = -(-half // 8) * 8       # round up to sublane multiple (8)
        if bc < C:
            return bc
    return C


def batchnorm2d_add(x42, x29, gamma, beta, eps=1e-5, block_c=None):
    """BatchNorm2d (batch statistics) over NCHW input x42, then add x29."""
    assert x42.shape == x29.shape
    N, C, H, W = x42.shape
    hw = H * W

    # Free reshapes (no HBM copies): channels on the sublane axis, flattened
    # spatial on the lane axis, batch leading.
    x3 = x42.reshape(N, C, hw)
    r3 = x29.reshape(N, C, hw)
    g3 = gamma.astype(jnp.float32).reshape(1, C, 1)
    b3 = beta.astype(jnp.float32).reshape(1, C, 1)

    if block_c is None:
        block_c = _pick_block_c(C)
    grid = (pl.cdiv(C, block_c),)

    slab_spec = pl.BlockSpec((N, block_c, hw), lambda i: (0, i, 0))
    vec_spec = pl.BlockSpec((1, block_c, 1), lambda i: (0, i, 0))

    out3 = pl.pallas_call(
        functools.partial(_bn_add_kernel, eps=float(eps),
                          inv_count=1.0 / float(N * hw)),
        out_shape=jax.ShapeDtypeStruct((N, C, hw), x42.dtype),
        grid=grid,
        in_specs=[
            slab_spec,   # x
            slab_spec,   # residual
            vec_spec,    # gamma
            vec_spec,    # beta
        ],
        out_specs=slab_spec,
        compiler_params=pltpu.CompilerParams(
            dimension_semantics=("parallel",)),
    )(x3, r3, g3, b3)

    return out3.reshape(N, C, H, W)


if __name__ == "__main__":
    key = jax.random.PRNGKey(0)
    k1, k2, k3, k4 = jax.random.split(key, 4)

    N, C, H, W = 1, 24, 56, 56
    x42 = jax.random.normal(k1, (N, C, H, W), dtype=jnp.float32)
    x29 = jax.random.normal(k2, (N, C, H, W), dtype=jnp.float32)

    # Deterministic (non-trivial) affine parameters for BatchNorm2d(24).
    gamma = 1.0 + 0.1 * jax.random.normal(k3, (C,), dtype=jnp.float32)
    beta = 0.1 * jax.random.normal(k4, (C,), dtype=jnp.float32)

    out = batchnorm2d_add(x42, x29, gamma, beta, eps=1e-5)
    out = jax.block_until_ready(out)

    # Pure-JAX reference check (training-mode BN: batch statistics).
    mean = jnp.mean(x42, axis=(0, 2, 3), keepdims=True)
    var = jnp.mean((x42 - mean) ** 2, axis=(0, 2, 3), keepdims=True)
    ref = (x42 - mean) / jnp.sqrt(var + 1e-5)
    ref = ref * gamma.reshape(1, C, 1, 1) + beta.reshape(1, C, 1, 1) + x29
    assert out.shape == (N, C, H, W)
    assert jnp.allclose(out, ref, atol=1e-4, rtol=1e-4)

    print("KERNEL_OK")
</pallas_src>

<mosaic_0001>
module attributes {stable_mosaic.version = 11 : i64} {
  func.func @_bn_add_kernel(%arg0: i32, %arg1: memref<1x24x3136xf32, #tpu.memory_space<vmem>>, %arg2: memref<1x24x3136xf32, #tpu.memory_space<vmem>>, %arg3: memref<1x24x1xf32, #tpu.memory_space<vmem>>, %arg4: memref<1x24x1xf32, #tpu.memory_space<vmem>>, %arg5: memref<1x24x3136xf32, #tpu.memory_space<vmem>>) attributes {dimension_semantics = [#tpu.dimension_semantics<parallel>], iteration_bounds = array<i64: 1>, scalar_prefetch = 0 : i64, scratch_operands = 0 : i64, tpu.core_type = #tpu.core_type<tc>, window_params = [{transform_indices = @transform_0, window_bounds = array<i64: 1, 24, 3136>}, {transform_indices = @transform_1, window_bounds = array<i64: 1, 24, 3136>}, {transform_indices = @transform_2, window_bounds = array<i64: 1, 24, 1>}, {transform_indices = @transform_3, window_bounds = array<i64: 1, 24, 1>}, {transform_indices = @transform_4, window_bounds = array<i64: 1, 24, 3136>}]} {
    %c0 = arith.constant 0 : index
    %c0_0 = arith.constant 0 : index
    %c0_1 = arith.constant 0 : index
    %0 = vector.load %arg1[%c0, %c0_0, %c0_1] : memref<1x24x3136xf32, #tpu.memory_space<vmem>>, vector<1x24x3136xf32>
    %cst = arith.constant dense<0.000000e+00> : vector<1x24xf32>
    %1 = vector.multi_reduction <add>, %0, %cst [2] : vector<1x24x3136xf32> to vector<1x24xf32>
    %2 = vector.shape_cast %1 : vector<1x24xf32> to vector<1x24x1xf32>
    %cst_2 = arith.constant dense<0.000000e+00> : vector<24x1xf32>
    %3 = vector.multi_reduction <add>, %2, %cst_2 [0] : vector<1x24x1xf32> to vector<24x1xf32>
    %4 = vector.shape_cast %3 : vector<24x1xf32> to vector<1x24x1xf32>
    %5 = arith.mulf %0, %0 : vector<1x24x3136xf32>
    %cst_3 = arith.constant dense<0.000000e+00> : vector<1x24xf32>
    %6 = vector.multi_reduction <add>, %5, %cst_3 [2] : vector<1x24x3136xf32> to vector<1x24xf32>
    %7 = vector.shape_cast %6 : vector<1x24xf32> to vector<1x24x1xf32>
    %cst_4 = arith.constant dense<0.000000e+00> : vector<24x1xf32>
    %8 = vector.multi_reduction <add>, %7, %cst_4 [0] : vector<1x24x1xf32> to vector<24x1xf32>
    %9 = vector.shape_cast %8 : vector<24x1xf32> to vector<1x24x1xf32>
    %cst_5 = arith.constant 3.18877544E-4 : f32
    %10 = vector.broadcast %cst_5 : f32 to vector<1x24x1xf32>
    %11 = arith.mulf %4, %10 : vector<1x24x1xf32>
    %cst_6 = arith.constant 3.18877544E-4 : f32
    %12 = vector.broadcast %cst_6 : f32 to vector<1x24x1xf32>
    %13 = arith.mulf %9, %12 : vector<1x24x1xf32>
    %14 = arith.mulf %11, %11 : vector<1x24x1xf32>
    %15 = arith.subf %13, %14 : vector<1x24x1xf32>
    %cst_7 = arith.constant 0.000000e+00 : f32
    %16 = vector.broadcast %cst_7 : f32 to vector<1x24x1xf32>
    %17 = arith.maximumf %15, %16 : vector<1x24x1xf32>
    %c0_8 = arith.constant 0 : index
    %c0_9 = arith.constant 0 : index
    %c0_10 = arith.constant 0 : index
    %18 = vector.load %arg3[%c0_8, %c0_9, %c0_10] : memref<1x24x1xf32, #tpu.memory_space<vmem>>, vector<1x24x1xf32>
    %cst_11 = arith.constant 9.99999974E-6 : f32
    %19 = vector.broadcast %cst_11 : f32 to vector<1x24x1xf32>
    %20 = arith.addf %17, %19 : vector<1x24x1xf32>
    %21 = math.rsqrt %20 : vector<1x24x1xf32>
    %22 = arith.mulf %18, %21 : vector<1x24x1xf32>
    %c0_12 = arith.constant 0 : index
    %c0_13 = arith.constant 0 : index
    %c0_14 = arith.constant 0 : index
    %23 = vector.load %arg4[%c0_12, %c0_13, %c0_14] : memref<1x24x1xf32, #tpu.memory_space<vmem>>, vector<1x24x1xf32>
    %24 = arith.mulf %11, %22 : vector<1x24x1xf32>
    %25 = arith.subf %23, %24 : vector<1x24x1xf32>
    %26 = vector.broadcast %22 : vector<1x24x1xf32> to vector<1x24x3136xf32>
    %27 = arith.mulf %0, %26 : vector<1x24x3136xf32>
    %28 = vector.broadcast %25 : vector<1x24x1xf32> to vector<1x24x3136xf32>
    %29 = arith.addf %27, %28 : vector<1x24x3136xf32>
    %c0_15 = arith.constant 0 : index
    %c0_16 = arith.constant 0 : index
    %c0_17 = arith.constant 0 : index
    %30 = vector.load %arg2[%c0_15, %c0_16, %c0_17] : memref<1x24x3136xf32, #tpu.memory_space<vmem>>, vector<1x24x3136xf32>
    %31 = arith.addf %29, %30 : vector<1x24x3136xf32>
    %c0_18 = arith.constant 0 : index
    %c0_19 = arith.constant 0 : index
    %c0_20 = arith.constant 0 : index
    %32 = vector.load %arg5[%c0_18, %c0_19, %c0_20] : memref<1x24x3136xf32, #tpu.memory_space<vmem>>, vector<1x24x3136xf32>
    tpu.vector_store %arg5[%c0_18, %c0_19, %c0_20], %31 {strides = array<i32>} : memref<1x24x3136xf32, #tpu.memory_space<vmem>>, vector<1x24x3136xf32>,
    return
  }
  func.func @transform_0(%arg0: i32) -> (i32, i32, i32) {
    %c0_i32 = arith.constant 0 : i32
    %c0_i32_0 = arith.constant 0 : i32
    %c0_i32_1 = arith.constant 0 : i32
    return %c0_i32, %arg0, %c0_i32_0 : i32, i32, i32
  }
  func.func @transform_1(%arg0: i32) -> (i32, i32, i32) {
    %c0_i32 = arith.constant 0 : i32
    %c0_i32_0 = arith.constant 0 : i32
    %c0_i32_1 = arith.constant 0 : i32
    return %c0_i32, %arg0, %c0_i32_0 : i32, i32, i32
  }
  func.func @transform_2(%arg0: i32) -> (i32, i32, i32) {
    %c0_i32 = arith.constant 0 : i32
    %c0_i32_0 = arith.constant 0 : i32
    %c0_i32_1 = arith.constant 0 : i32
    return %c0_i32, %arg0, %c0_i32_0 : i32, i32, i32
  }
  func.func @transform_3(%arg0: i32) -> (i32, i32, i32) {
    %c0_i32 = arith.constant 0 : i32
    %c0_i32_0 = arith.constant 0 : i32
    %c0_i32_1 = arith.constant 0 : i32
    return %c0_i32, %arg0, %c0_i32_0 : i32, i32, i32
  }
  func.func @transform_4(%arg0: i32) -> (i32, i32, i32) {
    %c0_i32 = arith.constant 0 : i32
    %c0_i32_0 = arith.constant 0 : i32
    %c0_i32_1 = arith.constant 0 : i32
    return %c0_i32, %arg0, %c0_i32_0 : i32, i32, i32
  }
}

</mosaic_0001>

<bundles_post_ra>
// kernel: tpu_custom_call.1
= control target key start
LH: loop header
LB: loop body
LE: loop exit
PB: predicated region body
PF: predicated region fallthrough
CT: control target
= control target key end

     0   :  { %9 = vsyncpa [#allocation3], 0  ;;  %s1618_s0 = inlined_call_operand.hbm [shape: f32[1,24,3136], index: 0, kind: input, shape index: {}]   ;;  %s1619_s1 = inlined_call_operand.hbm [shape: f32[1,24,3136], index: 1, kind: input, shape index: {}]   ;;  %s1620_s2 = inlined_call_operand.vmem [shape: f32[1,24,1], index: 2, kind: input, shape index: {}]   ;;  %s1621_s3 = inlined_call_operand.vmem [shape: f32[1,24,1], index: 3, kind: input, shape index: {}]   ;;  %s1622_s4 = inlined_call_operand.hbm [shape: f32[1,24,3136], index: 4, kind: output, shape index: {}]  }
   0x1   :  { %10 = vsyncpa [#allocation6], 0 }
   0x2   :  { %11 = vsyncpa [#allocation4], 0  ;;  %s925_s15 = smov [#allocation2]   ;;  %s853_s19 = scalar_lea.hbm %s1618_s0, 9600 }
   0x3   :  { %s17_s16 = sshll.u32 %s925_s15, 4  ;;  %p854_p0 = scmp.ne.s32.totalorder %s1618_s0, %s853_s19  ;;  %s18_s16 = int_to_ptr.vmem [resolvable:$true] %s17_s16 }
   0x4   :  { %p857_p1 = scmp.lt.u32.totalorder %s853_s19, %s1618_s0 }
   0x6   :  { %p859_p2 = pnand %p857_p1, %p854_p0 }
   0x8   :  { %862 = shalt.err (!%p859_p2)
}
   0x9   :  { %s863_s24 = scalar_lea.vmem %s18_s16, 9600  ;;  %p868_p4 = scmp.lt.s32.totalorder %s18_s16, %s18_s16 }
   0xa   :  { %p864_p3 = scmp.ne.s32.totalorder %s18_s16, %s863_s24  ;;  %p869_p5 = scmp.lt.s32.totalorder %s863_s24, %s863_s24 }
   0xc   :  { %p870_p6 = por %p869_p5, %p868_p4 }
   0xe   :  { %p871_p7 = pnand %p870_p6, %p864_p3 }
  0x10   :  { %874 = shalt.err (!%p871_p7)
}
  0x11   :  { %s926_s25 = smov 3200   ;;  %s927_s26 = smov 200  }
  0x12   :  { %23 = dma.hbm_to_vmem [thread:$0]  %s1618_s0, 9600, %s18_s16, [#allocation3], %s926_s25, %s926_s25, %s927_s26  }
  0x13   :  { %s928_s29 = smov [#allocation5]   ;;  %s875_s7 = scalar_lea.hbm %s1619_s1, 9600 }
  0x14   :  { %s29_s30 = sshll.u32 %s928_s29, 4  ;;  %p876_p8 = scmp.ne.s32.totalorder %s1619_s1, %s875_s7  ;;  %s30_s30 = int_to_ptr.vmem [resolvable:$true] %s29_s30 }
  0x15   :  { %p879_p9 = scmp.lt.u32.totalorder %s875_s7, %s1619_s1 }
  0x17   :  { %p881_p10 = pnand %p879_p9, %p876_p8 }
  0x19   :  { %884 = shalt.err (!%p881_p10)
}
  0x1a   :  { %s885_s12 = scalar_lea.vmem %s30_s30, 9600  ;;  %p890_p12 = scmp.lt.s32.totalorder %s30_s30, %s30_s30 }
  0x1b   :  { %p886_p11 = scmp.ne.s32.totalorder %s30_s30, %s885_s12  ;;  %p891_p13 = scmp.lt.s32.totalorder %s885_s12, %s885_s12 }
  0x1d   :  { %p892_p0 = por %p891_p13, %p890_p12 }
  0x1f   :  { %p893_p1 = pnand %p892_p0, %p886_p11 }
  0x21   :  { %896 = shalt.err (!%p893_p1)
}
  0x22   :  { %35 = dma.hbm_to_vmem [thread:$0]  %s1619_s1, 9600, %s30_s30, [#allocation6], %s926_s25, %s926_s25, %s927_s26  }
  0x23   :  { %919 = dma.done.wait [#allocation3], 9600  }
  0x24   :  { %920 = vsyncadd [#allocation3], 4294957696 }
  0x25   :  { %921 = dma.done.wait [#allocation6], 9600  }
  0x26   :  { %922 = vsyncadd [#allocation6], 4294957696  ;;  %v986_v0 = vld [vmem:[#allocation2 + $0x190] sm:$0xff]  ;;  %v988_v1 = vld [vmem:[#allocation2 + $0x198] sm:$0xff]  ;;  %vm144_vm0 = vcmask 523264  }
  0x27   :  { %1645 = vst [vmem:[#allocation11_spill] sm:$0xff] %v986_v0  ;;  %1646 = vst [vmem:[#allocation12_spill] sm:$0xff] %v988_v1  ;;  %v990_v2 = vld [vmem:[#allocation2 + $0x1a0] sm:$0xff]  ;;  %v176_v3 = vadd.f32 %v988_v1, %v986_v0  ;;  %v994_v4 = vld [vmem:[#allocation2 + $0x1a8] sm:$0xff]  ;;  %v256_v6 = vmul.f32 %v986_v0, %v986_v0  ;;  %v257_v7 = vmul.f32 %v988_v1, %v988_v1 }
  0x28   :  { %1647 = vst [vmem:[#allocation13_spill] sm:$0xff] %v990_v2  ;;  %1648 = vst [vmem:[#allocation14_spill] sm:$0xff] %v994_v4  ;;  %v1001_v8 = vld [vmem:[#allocation2 + $0x1b0] sm:$0xff]  ;;  %v1004_v10 = vld [vmem:[#allocation2 + $0x1b8] sm:$0xff]  ;;  %v258_v12 = vmul.f32 %v990_v2, %v990_v2  ;;  %v259_v24 = vmul.f32 %v994_v4, %v994_v4 }
  0x29   :  { %v177_v5 = vadd.f32 %v176_v3, %v990_v2  ;;  %1649 = vst [vmem:[#allocation15_spill] sm:$0xff] %v1001_v8  ;;  %1650 = vst [vmem:[#allocation16_spill] sm:$0xff] %v1004_v10  ;;  %v335_v13 = vadd.f32 %v257_v7, %v256_v6  ;;  %v1009_v14 = vld [vmem:[#allocation2 + $0x1c0] sm:$0xff]  ;;  %v1013_v16 = vld [vmem:[#allocation2 + $0x8] sm:$0xff]  ;;  %v260_v36 = vmul.f32 %v1001_v8, %v1001_v8 }
  0x2a   :  { %1651 = vst [vmem:[#allocation17_spill] sm:$0xff] %v1009_v14  ;;  %v1011_v15 = vld [vmem:[#allocation2] sm:$0xff]  ;;  %v1016_v18 = vld [vmem:[#allocation2 + $0x10] sm:$0xff]  ;;  %v103_v20 = vld [vmem:[#allocation2 + $0x1c8] sm:$0xff]  ;;  %v207_v33 = vmul.f32 %v1013_v16, %v1013_v16  ;;  %v261_v46 = vmul.f32 %v1004_v10, %v1004_v10  ;;  %v262_v52 = vmul.f32 %v1009_v14, %v1009_v14 }
  0x2b   :  { %v178_v9 = vadd.f32 %v177_v5, %v994_v4  ;;  %v121_v19 = vadd.f32 %v1013_v16, %v1011_v15  ;;  %v1020_v21 = vld [vmem:[#allocation2 + $0x18] sm:$0xff]  ;;  %v336_v25 = vadd.f32 %v335_v13, %v258_v12  ;;  %v104_v26 = vld [vmem:[#allocation2 + $0x1d0] sm:$0xff]  ;;  %v1026_v27 = vld [vmem:[#allocation2 + $0x20] sm:$0xff]  ;;  %v206_v32 = vmul.f32 %v1011_v15, %v1011_v15 }
  0x2c   :  { %v105_v30 = vld [vmem:[#allocation2 + $0x1d8] sm:$0xff]  ;;  %v1029_v31 = vld [vmem:[#allocation2 + $0x28] sm:$0xff]  ;;  %v106_v38 = vld [vmem:[#allocation2 + $0x1e0] sm:$0xff]  ;;  %v208_v40 = vmul.f32 %v1016_v18, %v1016_v18  ;;  %v209_v49 = vmul.f32 %v1020_v21, %v1020_v21  ;;  %v263_v56 = vmul.f32 %v103_v20, %v103_v20  ;;  %v210_v60 = vmul.f32 %v1026_v27, %v1026_v27 }
  0x2d   :  { %v179_v11 = vadd.f32 %v178_v9, %v1001_v8  ;;  %v122_v23 = vadd.f32 %v121_v19, %v1016_v18  ;;  %v337_v37 = vadd.f32 %v336_v25, %v259_v24  ;;  %v1038_v39 = vld [vmem:[#allocation2 + $0x30] sm:$0xff]  ;;  %v1042_v41 = vld [vmem:[#allocation2 + $0xc8] sm:$0xff]  ;;  %v1047_v45 = vld [vmem:[#allocation2 + $0xd8] sm:$0xff]  ;;  %v281_v50 = vadd.f32 %v207_v33, %v206_v32 }
  0x2e   :  { %v1045_v44 = vld [vmem:[#allocation2 + $0xd0] sm:$0xff]  ;;  %1652 = vst [vmem:[#allocation18_spill] sm:$0xff] %v1047_v45  ;;  %v107_v47 = vld [vmem:[#allocation2 + $0x1e8] sm:$0xff]  ;;  %v1051_v48 = vld [vmem:[#allocation2 + $0x38] sm:$0xff]  ;;  %v264_v63 = vmul.f32 %v104_v26, %v104_v26  ;;  %v265_v7 = vmul.f32 %v105_v30, %v105_v30  ;;  %v211_v13 = vmul.f32 %v1029_v31, %v1029_v31 }
  0x2f   :  { %v180_v17 = vadd.f32 %v179_v11, %v1004_v10  ;;  %v123_v29 = vadd.f32 %v122_v23, %v1020_v21  ;;  %v149_v51 = vadd.f32 %v1045_v44, %v1042_v41  ;;  %v1060_v55 = vld [vmem:[#allocation2 + $0xe0] sm:$0xff]  ;;  %v338_v57 = vadd.f32 %v337_v37, %v260_v36  ;;  %v108_v58 = vld [vmem:[#allocation2 + $0x1f0] sm:$0xff]  ;;  %v1068_v6 = vld [vmem:[#allocation2 + $0xe8] sm:$0xff] }
  0x30   :  { %1653 = vst [vmem:[#allocation19_spill] sm:$0xff] %v1060_v55  ;;  %v1062_v59 = vld [vmem:[#allocation2 + $0x40] sm:$0xff]  ;;  %v282_v61 = vadd.f32 %v281_v50, %v208_v40  ;;  %1654 = vst [vmem:[#allocation20_spill] sm:$0xff] %v1068_v6  ;;  %v109_v11 = vld [vmem:[#allocation2 + $0x1f8] sm:$0xff]  ;;  %v267_v25 = vmul.f32 %v107_v47, %v107_v47  ;;  %v233_v10 = vmul.f32 %v1047_v45, %v1047_v45 }
  0x31   :  { %v181_v22 = vadd.f32 %v180_v17, %v1009_v14  ;;  %v124_v35 = vadd.f32 %v123_v29, %v1026_v27  ;;  %v150_v62 = vadd.f32 %v149_v51, %v1047_v45  ;;  %v339_v9 = vadd.f32 %v338_v57, %v261_v46  ;;  %v1070_v12 = vld [vmem:[#allocation2 + $0x48] sm:$0xff]  ;;  %v1076_v24 = vld [vmem:[#allocation2 + $0xf0] sm:$0xff]  ;;  %v1084_v37 = vld [vmem:[#allocation2 + $0xf8] sm:$0xff] }
  0x32   :  { %v283_v17 = vadd.f32 %v282_v61, %v209_v49  ;;  %1655 = vst [vmem:[#allocation21_spill] sm:$0xff] %v1076_v24  ;;  %v1078_v29 = vld [vmem:[#allocation2 + $0x50] sm:$0xff]  ;;  %1656 = vst [vmem:[#allocation22_spill] sm:$0xff] %v1084_v37  ;;  %v213_v46 = vmul.f32 %v1051_v48, %v1051_v48  ;;  %v214_v61 = vmul.f32 %v1062_v59, %v1062_v59  ;;  %v1160_v8 = vld [vmem:[#allocation2 + $0x128] sm:$0xff] }
  0x33   :  { %v182_v28 = vadd.f32 %v181_v22, %v103_v20  ;;  %v125_v43 = vadd.f32 %v124_v35, %v1029_v31  ;;  %v151_v19 = vadd.f32 %v150_v62, %v1060_v55  ;;  %v266_v20 = vmul.f32 %v106_v38, %v106_v38  ;;  %v112_v51 = vld [vmem:[#allocation2 + $0x210] sm:$0xff]  ;;  %v1165_v4 = vld [vmem:[#allocation2 + $0x88] sm:$0xff] }
  0x34   :  { %v284_v32 = vadd.f32 %v283_v17, %v210_v60  ;;  %v1100_v60 = vld [vmem:[#allocation2 + $0x60] sm:$0xff]  ;;  %v1108_v17 = vld [vmem:[#allocation2 + $0x108] sm:$0xff]  ;;  %v1173_v1 = vld [vmem:[#allocation2 + $0x130] sm:$0xff] }
  0x35   :  { %v183_v34 = vadd.f32 %v182_v28, %v104_v26  ;;  %v126_v54 = vadd.f32 %v125_v43, %v1038_v39  ;;  %v340_v26 = vadd.f32 %v339_v9, %v262_v52  ;;  %v110_v28 = vld [vmem:[#allocation2 + $0x200] sm:$0xff]  ;;  %v152_v33 = vadd.f32 %v151_v19, %v1068_v6  ;;  %v1088_v43 = vld [vmem:[#allocation2 + $0x58] sm:$0xff]  ;;  %1658 = vst [vmem:[#allocation24_spill] sm:$0xff] %v1108_v17  ;;  %v1178_v0 = vld [vmem:[#allocation2 + $0x90] sm:$0xff] }
  0x36   :  { %v1093_v50 = vmul.f32 %v110_v28, %v110_v28  ;;  %v114_v9 = vld [vmem:[#allocation2 + $0x220] sm:$0xff] }
  0x37   :  { %v184_v42 = vadd.f32 %v183_v34, %v105_v30  ;;  %v127_v5 = vadd.f32 %v126_v54, %v1051_v48  ;;  %v212_v30 = vmul.f32 %v1038_v39, %v1038_v39  ;;  %v268_v34 = vmul.f32 %v108_v58, %v108_v58  ;;  %v1096_v54 = vld [vmem:[#allocation2 + $0x100] sm:$0xff] }
  0x38   :  { %v341_v40 = vadd.f32 %v340_v26, %v263_v56  ;;  %v153_v49 = vadd.f32 %v152_v33, %v1076_v24  ;;  %1657 = vst [vmem:[#allocation23_spill] sm:$0xff] %v1096_v54  ;;  %v215_v26 = vmul.f32 %v1070_v12, %v1070_v12  ;;  %v116_v33 = vld [vmem:[#allocation2 + $0x230] sm:$0xff] }
  0x39   :  { %v185_v53 = vadd.f32 %v184_v42, %v106_v38  ;;  %v128_v23 = vadd.f32 %v127_v5, %v1062_v59  ;;  %v1086_v38 = vmul.f32 %v109_v11, %v109_v11  ;;  %v111_v42 = vld [vmem:[#allocation2 + $0x208] sm:$0xff]  ;;  %v1105_v5 = vmul.f32 %v112_v51, %v112_v51 }
  0x3a   :  { %v1098_v57 = vmul.f32 %v111_v42, %v111_v42  ;;  %v342_v56 = vadd.f32 %v341_v40, %v264_v63  ;;  %v1120_v40 = vld [vmem:[#allocation2 + $0x110] sm:$0xff] }
  0x3b   :  { %v186_v3 = vadd.f32 %v185_v53, %v107_v47  ;;  %v129_v36 = vadd.f32 %v128_v23, %v1070_v12  ;;  %v285_v47 = vadd.f32 %v284_v32, %v211_v13  ;;  %v1112_v23 = vld [vmem:[#allocation2 + $0x68] sm:$0xff]  ;;  %v1117_v32 = vmul.f32 %v114_v9, %v114_v9  ;;  %1659 = vst [vmem:[#allocation25_spill] sm:$0xff] %v1120_v40 }
  0x3c   :  { %v343_v63 = vadd.f32 %v342_v56, %v265_v7  ;;  %v1131_v56 = vmul.f32 %v116_v33, %v116_v33 }
  0x3d   :  { %v187_v22 = vadd.f32 %v186_v3, %v108_v58  ;;  %v130_v53 = vadd.f32 %v129_v36, %v1078_v29  ;;  %v113_v58 = vld [vmem:[#allocation2 + $0x218] sm:$0xff]  ;;  %v286_v62 = vadd.f32 %v285_v47, %v212_v30  ;;  %v154_v3 = vadd.f32 %v153_v49, %v1084_v37  ;;  %v1124_v47 = vld [vmem:[#allocation2 + $0x250] sm:$0xff] }
  0x3e   :  { %v1110_v19 = vmul.f32 %v113_v58, %v113_v58  ;;  %v344_v7 = vadd.f32 %v343_v63, %v266_v20  ;;  %v1126_v49 = vld [vmem:[#allocation2 + $0x70] sm:$0xff] }
  0x3f   :  { %v188_v35 = vadd.f32 %v187_v22, %v109_v11  ;;  %v131_v13 = vadd.f32 %v130_v53, %v1088_v43  ;;  %v115_v22 = vld [vmem:[#allocation2 + $0x228] sm:$0xff]  ;;  %v155_v30 = vadd.f32 %v154_v3, %v1096_v54  ;;  %v217_v3 = vmul.f32 %v1088_v43, %v1088_v43 }
  0x40   :  { %v345_v20 = vadd.f32 %v344_v7, %v267_v25  ;;  %v1150_v7 = vld [vmem:[#allocation2 + $0x80] sm:$0xff]  ;;  %v220_v2 = vmul.f32 %v1126_v49, %v1126_v49 }
  0x41   :  { %v189_v52 = vadd.f32 %v188_v35, %v110_v28  ;;  %v287_v28 = vadd.f32 %v286_v62, %v213_v46  ;;  %v132_v36 = vadd.f32 %v131_v13, %v1100_v60  ;;  %v216_v46 = vmul.f32 %v1078_v29, %v1078_v29  ;;  %v1138_v13 = vld [vmem:[#allocation2 + $0x78] sm:$0xff] }
  0x42   :  { %v156_v53 = vadd.f32 %v155_v30, %v1108_v17  ;;  %v199_v30 = vsel %vm144_vm0, %v1124_v47, 0.0  ;;  %v346_v25 = vadd.f32 %v345_v20, %v268_v34  ;;  %v1163_v20 = vld [vmem:[#allocation2 + $0x238] sm:$0xff] }
  0x43   :  { %v190_v11 = vadd.f32 %v189_v52, %v111_v42  ;;  %v1122_v42 = vmul.f32 %v115_v22, %v115_v22  ;;  %v288_v52 = vadd.f32 %v287_v28, %v214_v61  ;;  %v133_v62 = vadd.f32 %v132_v36, %v1112_v23  ;;  %v1148_v36 = vld [vmem:[#allocation2 + $0x120] sm:$0xff]  ;;  %1661 = vst [vmem:[#allocation27_spill] sm:$0xff] %v1163_v20 }
  0x44   :  { %v157_v14 = vadd.f32 %v156_v53, %v1120_v40  ;;  %v231_v61 = vmul.f32 %v1042_v41, %v1042_v41  ;;  %v232_v28 = vmul.f32 %v1045_v44, %v1045_v44  ;;  %v347_v34 = vadd.f32 %v346_v25, %v1086_v38  ;;  %v1176_v25 = vld [vmem:[#allocation2 + $0x240] sm:$0xff] }
  0x45   :  { %v191_v35 = vadd.f32 %v190_v11, %v112_v51  ;;  %v1136_v11 = vld [vmem:[#allocation2 + $0x118] sm:$0xff]  ;;  %v289_v63 = vadd.f32 %v288_v52, %v215_v26  ;;  %v218_v26 = vmul.f32 %v1100_v60, %v1100_v60  ;;  %1662 = vst [vmem:[#allocation28_spill] sm:$0xff] %v1176_v25 }
  0x46   :  { %1660 = vst [vmem:[#allocation26_spill] sm:$0xff] %v1136_v11  ;;  %v158_v53 = vadd.f32 %v157_v14, %v1136_v11  ;;  %v348_v38 = vadd.f32 %v347_v34, %v1093_v50  ;;  %v1190_v34 = vld [vmem:[#allocation2 + $0x248] sm:$0xff] }
  0x47   :  { %v192_v51 = vadd.f32 %v191_v35, %v113_v58  ;;  %v134_v35 = vadd.f32 %v133_v62, %v1126_v49  ;;  %v290_v52 = vadd.f32 %v289_v63, %v216_v46  ;;  %v219_v62 = vmul.f32 %v1112_v23, %v1112_v23  ;;  %1663 = vst [vmem:[#allocation29_spill] sm:$0xff] %v1190_v34 }
  0x48   :  { %v159_v14 = vadd.f32 %v158_v53, %v1148_v36  ;;  %v234_v63 = vmul.f32 %v1060_v55, %v1060_v55  ;;  %v349_v50 = vadd.f32 %v348_v38, %v1098_v57  ;;  %v1201_v55 = vld [vmem:[#allocation2 + $0x140] sm:$0xff] }
  0x49   :  { %v193_v58 = vadd.f32 %v192_v51, %v114_v9  ;;  %v135_v51 = vadd.f32 %v134_v35, %v1138_v13  ;;  %v291_v46 = vadd.f32 %v290_v52, %v217_v3  ;;  %1664 = vst [vmem:[#allocation30_spill] sm:$0xff] %v1201_v55  ;;  %v1204_v38 = vld [vmem:[#allocation2 + $0xa0] sm:$0xff] }
  0x4a   :  { %v160_v52 = vadd.f32 %v159_v14, %v1160_v8  ;;  %v350_v57 = vadd.f32 %v349_v50, %v1105_v5  ;;  %v1216_v50 = vld [vmem:[#allocation2 + $0xa8] sm:$0xff] }
  0x4b   :  { %v194_v9 = vadd.f32 %v193_v58, %v115_v22  ;;  %v308_v22 = vadd.f32 %v232_v28, %v231_v61  ;;  %v136_v35 = vadd.f32 %v135_v51, %v1150_v7  ;;  %v292_v3 = vadd.f32 %v291_v46, %v218_v26  ;;  %v1187_v51 = vld [vmem:[#allocation2 + $0x138] sm:$0xff] }
  0x4c   :  { %v235_v61 = vmul.f32 %v1068_v6, %v1068_v6  ;;  %v1192_v26 = vld [vmem:[#allocation2 + $0x98] sm:$0xff]  ;;  %v161_v14 = vadd.f32 %v160_v52, %v1173_v1  ;;  %v222_v6 = vmul.f32 %v1150_v7, %v1150_v7  ;;  %v237_v52 = vmul.f32 %v1084_v37, %v1084_v37  ;;  %v1224_v37 = vld [vmem:[#allocation2 + $0x150] sm:$0xff] }
  0x4d   :  { %v195_v58 = vadd.f32 %v194_v9, %v116_v33  ;;  %v309_v33 = vadd.f32 %v308_v22, %v233_v10  ;;  %v137_v53 = vadd.f32 %v136_v35, %v1165_v4  ;;  %v221_v9 = vmul.f32 %v1138_v13, %v1138_v13 }
  0x4e   :  { %v293_v46 = vadd.f32 %v292_v3, %v219_v62  ;;  %v236_v10 = vmul.f32 %v1076_v24, %v1076_v24  ;;  %v162_v3 = vadd.f32 %v161_v14, %v1187_v51  ;;  %v1213_v24 = vld [vmem:[#allocation2 + $0x148] sm:$0xff]  ;;  %v351_v5 = vadd.f32 %v350_v57, %v1110_v19  ;;  %v1227_v19 = vld [vmem:[#allocation2 + $0xb0] sm:$0xff]  ;;  %v1229_v57 = vld [vmem:[#allocation2 + $0xc0] sm:$0xff] }
  0x4f   :  { %v196_v28 = vadd.f32 %v195_v58, %v1163_v20  ;;  %v310_v22 = vadd.f32 %v309_v33, %v234_v63  ;;  %v138_v35 = vadd.f32 %v137_v53, %v1178_v0  ;;  %v223_v53 = vmul.f32 %v1165_v4, %v1165_v4 }
  0x50   :  { %v294_v62 = vadd.f32 %v293_v46, %v220_v2  ;;  %v163_v46 = vadd.f32 %v162_v3, %v1201_v55  ;;  %v238_v14 = vmul.f32 %v1096_v54, %v1096_v54  ;;  %v352_v45 = vadd.f32 %v351_v5, %v1117_v32 }
  0x51   :  { %v197_v58 = vadd.f32 %v196_v28, %v1176_v25  ;;  %v311_v63 = vadd.f32 %v310_v22, %v235_v61  ;;  %v139_v28 = vadd.f32 %v138_v35, %v1192_v26  ;;  %v224_v35 = vmul.f32 %v1178_v0, %v1178_v0 }
  0x52   :  { %v295_v2 = vadd.f32 %v294_v62, %v221_v9  ;;  %v164_v62 = vadd.f32 %v163_v46, %v1213_v24  ;;  %v277_v32 = vmul.f32 %v1163_v20, %v1163_v20  ;;  %v1252_v20 = vld [vmem:[#allocation2 + $0x160] sm:$0xff] }
  0x53   :  { %v198_v33 = vadd.f32 %v197_v58, %v1190_v34  ;;  %v312_v61 = vadd.f32 %v311_v63, %v236_v10  ;;  %v140_v58 = vadd.f32 %v139_v28, %v1204_v38  ;;  %v239_v10 = vmul.f32 %v1108_v17, %v1108_v17 }
  0x54   :  { %v296_v9 = vadd.f32 %v295_v2, %v222_v6  ;;  %v225_v63 = vmul.f32 %v1192_v26, %v1192_v26  ;;  %v353_v28 = vadd.f32 %v352_v45, %v1122_v42  ;;  %v1242_v6 = vld [vmem:[#allocation2 + $0xb8] sm:$0xff]  ;;  %v165_v2 = vadd.f32 %v164_v62, %v1224_v37 }
  0x55   :  { %v200_v22 = vadd.f32 %v199_v30, %v198_v33  ;;  %v313_v30 = vadd.f32 %v312_v61, %v237_v52  ;;  %v141_v3 = vadd.f32 %v140_v58, %v1216_v50  ;;  %v1237_v33 = vld [vmem:[#allocation2 + $0x158] sm:$0xff]  ;;  %v240_v52 = vmul.f32 %v1120_v40, %v1120_v40 }
  0x56   :  { %v297_v5 = vadd.f32 %v296_v9, %v223_v53  ;;  %v226_v58 = vmul.f32 %v1204_v38, %v1204_v38  ;;  %v354_v45 = vadd.f32 %v353_v28, %v1131_v56  ;;  %v166_v53 = vadd.f32 %v165_v2, %v1237_v33 }
  0x57   :  { %201 = vadd.xlane.f32.xlu1 %v200_v22  ;;  %v314_v46 = vadd.f32 %v313_v30, %v238_v14  ;;  %v142_v61 = vadd.f32 %v141_v3, %v1227_v19  ;;  %v145_v22 = vsel %vm144_vm0, %v1229_v57, 0.0  ;;  %v241_v9 = vmul.f32 %v1136_v11, %v1136_v11  ;;  %v1261_v3 = vld [vmem:[#allocation2 + $0x168] sm:$0xff] }
  0x58   :  { %v298_v42 = vadd.f32 %v297_v5, %v224_v35  ;;  %v227_v30 = vmul.f32 %v1216_v50, %v1216_v50  ;;  %v278_v40 = vmul.f32 %v1176_v25, %v1176_v25  ;;  %v242_v56 = vmul.f32 %v1148_v36, %v1148_v36 }
  0x59   :  { %v315_v62 = vadd.f32 %v314_v46, %v239_v10  ;;  %v143_v14 = vadd.f32 %v142_v61, %v1242_v6  ;;  %v167_v28 = vadd.f32 %v166_v53, %v1252_v20  ;;  %v355_v5 = vadd.f32 %v354_v45, %v277_v32  ;;  %v1270_v46 = vld [vmem:[#allocation2 + $0x170] sm:$0xff] }
  0x5a   :  { %v299_v35 = vadd.f32 %v298_v42, %v225_v63  ;;  %v228_v10 = vmul.f32 %v1227_v19, %v1227_v19  ;;  %v243_v25 = vmul.f32 %v1160_v8, %v1160_v8  ;;  %v229_v63 = vmul.f32 %v1242_v6, %v1242_v6  ;;  %v1285_v42 = vld [vmem:[#allocation2 + $0x188] sm:$0xff] }
  0x5b   :  { %v316_v2 = vadd.f32 %v315_v62, %v240_v52  ;;  %v146_v11 = vadd.f32 %v145_v22, %v143_v14  ;;  %v168_v17 = vadd.f32 %v167_v28, %v1261_v3  ;;  %v230_v32 = vmul.f32 %v1229_v57, %v1229_v57  ;;  %v1279_v52 = vld [vmem:[#allocation2 + $0x178] sm:$0xff]  ;;  %v1288_v62 = vld [vmem:[#allocation2 + $0x180] sm:$0xff] }
  0x5c   :  { %v300_v61 = vadd.f32 %v299_v35, %v226_v58  ;;  %v279_v22 = vmul.f32 %v1190_v34, %v1190_v34  ;;  %v244_v58 = vmul.f32 %v1173_v1, %v1173_v1  ;;  %v280_v14 = vmul.f32 %v1124_v47, %v1124_v47 }
  0x5d   :  { %v317_v54 = vadd.f32 %v316_v2, %v241_v9  ;;  %147 = vadd.xlane.f32.xlu0 %v146_v11  ;;  %v169_v53 = vadd.f32 %v168_v17, %v1270_v46  ;;  %v356_v11 = vadd.f32 %v355_v5, %v278_v40  ;;  %v245_v2 = vmul.f32 %v1187_v51, %v1187_v51 }
  0x5e   :  { %v301_v45 = vadd.f32 %v300_v61, %v227_v30  ;;  %v304_v30 = vsel %vm144_vm0, %v230_v32, 0.0  ;;  %v172_v61 = vsel %vm144_vm0, %v1285_v42, 0.0  ;;  %v358_v5 = vsel %vm144_vm0, %v280_v14, 0.0 }
  0x5f   :  { %v318_v9 = vadd.f32 %v317_v54, %v242_v56  ;;  %v170_v28 = vadd.f32 %v169_v53, %v1279_v52  ;;  %v246_v54 = vmul.f32 %v1201_v55, %v1201_v55  ;;  %v357_v56 = vadd.f32 %v356_v11, %v279_v22 }
  0x60   :  { %v302_v35 = vadd.f32 %v301_v45, %v228_v10  ;;  %v251_v11 = vmul.f32 %v1261_v3, %v1261_v3 }
  0x61   :  { %v319_v34 = vadd.f32 %v318_v9, %v243_v25  ;;  %v171_v40 = vadd.f32 %v170_v28, %v1288_v62  ;;  %v247_v25 = vmul.f32 %v1213_v24, %v1213_v24  ;;  %v359_v32 = vadd.f32 %v358_v5, %v357_v56 }
  0x62   :  { %v303_v17 = vadd.f32 %v302_v35, %v229_v63  ;;  %v248_v9 = vmul.f32 %v1224_v37, %v1224_v37  ;;  %v249_v63 = vmul.f32 %v1237_v33, %v1237_v33  ;;  %v252_v35 = vmul.f32 %v1270_v46, %v1270_v46 }
  0x63   :  { %v320_v47 = vadd.f32 %v319_v34, %v244_v58  ;;  %v173_v45 = vadd.f32 %v172_v61, %v171_v40  ;;  %v250_v34 = vmul.f32 %v1252_v20, %v1252_v20  ;;  %v254_v61 = vmul.f32 %v1288_v62, %v1288_v62 }
  0x64   :  { %v305_v10 = vadd.f32 %v304_v30, %v303_v17  ;;  %v929_v5 = vmov 0  }
  0x65   :  { %v321_v53 = vadd.f32 %v320_v47, %v245_v2  ;;  %174 = vadd.xlane.f32.xlu0 %v173_v45  ;;  %v253_v2 = vmul.f32 %v1279_v52, %v1279_v52  ;;  %831 = vset.pattern.permute.xlu1 %v929_v5 }
  0x66   :  { %306 = vadd.xlane.f32.xlu1 %v305_v10  ;;  %830 = vset.pattern.permute.xlu0 %v929_v5 }
  0x67   :  { %v322_v55 = vadd.f32 %v321_v53, %v246_v54 }
  0x69   :  { %v323_v22 = vadd.f32 %v322_v55, %v247_v25  ;;  %v255_v55 = vmul.f32 %v1285_v42, %v1285_v42 }
  0x6a   :  { %360 = vadd.xlane.f32.xlu1 %v359_v32 }
  0x6b   :  { %v324_v58 = vadd.f32 %v323_v22, %v248_v9  ;;  %v331_v40 = vsel %vm144_vm0, %v255_v55, 0.0 }
  0x6d   :  { %v325_v14 = vadd.f32 %v324_v58, %v249_v63 }
  0x6f   :  { %v326_v28 = vadd.f32 %v325_v14, %v250_v34 }
  0x71   :  { %v327_v30 = vadd.f32 %v326_v28, %v251_v11 }
  0x73   :  { %v328_v54 = vadd.f32 %v327_v30, %v252_v35  ;;  %v380_v30 = vld [vmem:[%s1620_s2] sm:$0xff] }
  0x75   :  { %v329_v17 = vadd.f32 %v328_v54, %v253_v2 }
  0x77   :  { %v330_v56 = vadd.f32 %v329_v17, %v254_v61 }
  0x79   :  { %v332_v47 = vadd.f32 %v331_v40, %v330_v56 }
  0x7b   :  { %333 = vadd.xlane.f32.xlu0 %v332_v47 }
  0xe4   :  { %v202_v10 = vpop.xlane.xlu1 %201 }
  0xe5   :  { %v367_v11 = vmul.f32 0.00031887754, %v202_v10 }
  0xe7   :  { %v373_v28 = vmul.f32 %v367_v11, %v367_v11 }
  0xea   :  { %v148_v45 = vpop.xlane.xlu0 %147 }
  0xeb   :  { %v365_v25 = vmul.f32 0.00031887754, %v148_v45 }
  0xed   :  { %v371_v32 = vmul.f32 %v365_v25, %v365_v25 }
  0xf2   :  { %v175_v14 = vpop.xlane.xlu0 %174 }
  0xf3   :  { %v307_v53 = vpop.xlane.xlu1 %306  ;;  %v366_v2 = vmul.f32 0.00031887754, %v175_v14 }
  0xf4   :  { %v368_v9 = vmul.f32 0.00031887754, %v307_v53 }
  0xf5   :  { %v372_v40 = vmul.f32 %v366_v2, %v366_v2 }
  0xf6   :  { %v374_v63 = vsub.f32 %v368_v9, %v371_v32  ;;  %v381_v32 = vld [vmem:[%s1620_s2 + $0x8] sm:$0xff] }
  0xf7   :  { %v361_v58 = vpop.xlane.xlu1 %360 }
  0xf8   :  { %v377_v22 = vmax.f32 %v374_v63, 0.0  ;;  %v370_v35 = vmul.f32 0.00031887754, %v361_v58 }
  0xfa   :  { %v383_v34 = vadd.f32 1e-05, %v377_v22  ;;  %v376_v61 = vsub.f32 %v370_v35, %v373_v28  ;;  %v392_v35 = vld [vmem:[%s1621_s3] sm:$0xff] }
  0xfc   :  { %832 = vrsqrt.f32 %v383_v34  ;;  %v379_v47 = vmax.f32 %v376_v61, 0.0  ;;  %v382_v34 = vld [vmem:[%s1620_s2 + $0x10] sm:$0xff]  ;;  %s930_s2 = smov [#allocation7]  }
  0xfe   :  { %v385_v53 = vadd.f32 1e-05, %v379_v47 }
 0x106   :  { %v833_v55 = vpop.eup %832 }
 0x107   :  { %v389_v17 = vmul.f32 %v833_v55, %v380_v30  ;;  %v393_v55 = vld [vmem:[%s1621_s3 + $0x8] sm:$0xff] }
 0x108   :  { %v334_v54 = vpop.xlane.xlu0 %333 }
 0x109   :  { %v369_v56 = vmul.f32 0.00031887754, %v334_v54  ;;  %403 = vperm.xlu0 %830, %v389_v17   ;;  %v395_v14 = vmul.f32 %v389_v17, %v365_v25 }
 0x10b   :  { %v375_v5 = vsub.f32 %v369_v56, %v372_v40  ;;  %v398_v28 = vsub.f32 %v392_v35, %v395_v14  ;;  %v394_v40 = vld [vmem:[%s1621_s3 + $0x10] sm:$0xff]  ;;  %v1678_v35 = vld [vmem:[#allocation25_spill] sm:$0xff]  ;;  %s811_s3 = sshll.u32 %s930_s2, 4  ;;  %s812_s3 = int_to_ptr.vmem [resolvable:$true] %s811_s3 }
 0x10c   :  { %s897_s27 = scalar_lea.vmem %s812_s3, 9600  ;;  %p902_p3 = scmp.lt.s32.totalorder %s812_s3, %s812_s3 }
 0x10d   :  { %v378_v45 = vmax.f32 %v375_v5, 0.0  ;;  %p898_p2 = scmp.ne.s32.totalorder %s812_s3, %s897_s27  ;;  %p903_p4 = scmp.lt.s32.totalorder %s897_s27, %s897_s27 }
 0x10f   :  { %v384_v10 = vadd.f32 1e-05, %v378_v45  ;;  %p904_p5 = por %p903_p4, %p902_p3 }
 0x111   :  { %834 = vrsqrt.f32 %v384_v10  ;;  %p905_p6 = pnand %p904_p5, %p898_p2 }
 0x112   :  { %836 = vrsqrt.f32 %v385_v53 }
 0x11b   :  { %v835_v9 = vpop.eup %834 }
 0x11c   :  { %v390_v63 = vmul.f32 %v835_v9, %v381_v32  ;;  %v837_v22 = vpop.eup %836 }
 0x11d   :  { %v391_v58 = vmul.f32 %v837_v22, %v382_v34 }
 0x11e   :  { %408 = vperm.xlu1 %831, %v390_v63   ;;  %v396_v30 = vmul.f32 %v390_v63, %v366_v2 }
 0x11f   :  { %v397_v54 = vmul.f32 %v391_v58, %v367_v11 }
 0x120   :  { %v399_v61 = vsub.f32 %v393_v55, %v396_v30  ;;  %v1680_v30 = vld [vmem:[#allocation26_spill] sm:$0xff] }
 0x121   :  { %v400_v25 = vsub.f32 %v394_v40, %v397_v54 }
 0x122   :  { %413 = vperm.xlu1 %831, %v391_v58  }
 0x126   :  { %493 = vperm.xlu1 %831, %v398_v28  }
 0x12a   :  { %498 = vperm.xlu1 %831, %v399_v61  }
 0x12e   :  { %503 = vperm.xlu1 %831, %v400_v25  }
 0x188   :  { %v404_v17 = vpop.permute.xlu0 %403 }
 0x189   :  { %v416_v56 = vmul.f32 %v404_v17, %v1011_v15  ;;  %v417_v47 = vmul.f32 %v404_v17, %v1013_v16  ;;  %v418_v2 = vmul.f32 %v404_v17, %v1016_v18  ;;  %v419_v5 = vmul.f32 %v404_v17, %v1020_v21 }
 0x18a   :  { %v420_v45 = vmul.f32 %v404_v17, %v1026_v27  ;;  %v421_v11 = vmul.f32 %v404_v17, %v1029_v31  ;;  %v422_v53 = vmul.f32 %v404_v17, %v1038_v39  ;;  %v423_v10 = vmul.f32 %v404_v17, %v1051_v48 }
 0x18b   :  { %v1348_v32 = vmul.f32 %v404_v17, %v1062_v59  ;;  %v1351_v9 = vmul.f32 %v404_v17, %v1070_v12  ;;  %v1354_v15 = vmul.f32 %v404_v17, %v1078_v29  ;;  %v1357_v16 = vmul.f32 %v404_v17, %v1088_v43 }
 0x18c   :  { %v1360_v18 = vmul.f32 %v404_v17, %v1100_v60  ;;  %v1363_v21 = vmul.f32 %v404_v17, %v1112_v23  ;;  %v1366_v27 = vmul.f32 %v404_v17, %v1126_v49  ;;  %v1369_v31 = vmul.f32 %v404_v17, %v1138_v13 }
 0x18d   :  { %v1372_v39 = vmul.f32 %v404_v17, %v1150_v7  ;;  %v1375_v48 = vmul.f32 %v404_v17, %v1165_v4  ;;  %v1378_v59 = vmul.f32 %v404_v17, %v1178_v0  ;;  %v1381_v12 = vmul.f32 %v404_v17, %v1192_v26  ;;  %v1665_v7 = vld [vmem:[#allocation18_spill] sm:$0xff] }
 0x18e   :  { %v1384_v29 = vmul.f32 %v404_v17, %v1204_v38  ;;  %v1387_v43 = vmul.f32 %v404_v17, %v1216_v50  ;;  %v1390_v60 = vmul.f32 %v404_v17, %v1227_v19  ;;  %v1393_v23 = vmul.f32 %v404_v17, %v1242_v6  ;;  %v1666_v38 = vld [vmem:[#allocation19_spill] sm:$0xff]  ;;  %v1668_v19 = vld [vmem:[#allocation20_spill] sm:$0xff]  ;;  %v1670_v6 = vld [vmem:[#allocation21_spill] sm:$0xff] }
 0x18f   :  { %v1396_v4 = vmul.f32 %v404_v17, %v1229_v57  ;;  %v1672_v57 = vld [vmem:[#allocation22_spill] sm:$0xff] }
 0x190   :  { %v1686_v17 = vld [vmem:[#allocation30_spill] sm:$0xff] }
 0x19d   :  { %v409_v0 = vpop.permute.xlu1 %408 }
 0x19e   :  { %v1399_v49 = vmul.f32 %v409_v0, %v1042_v41  ;;  %v1402_v13 = vmul.f32 %v409_v0, %v1045_v44  ;;  %v1405_v26 = vmul.f32 %v409_v0, %v1665_v7  ;;  %v1408_v50 = vmul.f32 %v409_v0, %v1666_v38  ;;  %v1674_v41 = vld [vmem:[#allocation23_spill] sm:$0xff]  ;;  %v1676_v44 = vld [vmem:[#allocation24_spill] sm:$0xff] }
 0x19f   :  { %v1411_v63 = vmul.f32 %v409_v0, %v1668_v19  ;;  %v1414_v22 = vmul.f32 %v409_v0, %v1670_v6  ;;  %v1417_v34 = vmul.f32 %v409_v0, %v1672_v57  ;;  %v1420_v58 = vmul.f32 %v409_v0, %v1674_v41 }
 0x1a0   :  { %1667 = vst [vmem:[#allocation18_spill] sm:$0xff] %v1408_v50  ;;  %v1423_v14 = vmul.f32 %v409_v0, %v1676_v44  ;;  %v1426_v28 = vmul.f32 %v409_v0, %v1678_v35  ;;  %v1429_v55 = vmul.f32 %v409_v0, %v1680_v30  ;;  %v1432_v61 = vmul.f32 %v409_v0, %v1148_v36  ;;  %v1702_v44 = vld [vmem:[#allocation13_spill] sm:$0xff]  ;;  %v1704_v35 = vld [vmem:[#allocation14_spill] sm:$0xff]  ;;  %v1706_v30 = vld [vmem:[#allocation15_spill] sm:$0xff] }
 0x1a1   :  { %1669 = vst [vmem:[#allocation19_spill] sm:$0xff] %v1411_v63  ;;  %1671 = vst [vmem:[#allocation20_spill] sm:$0xff] %v1414_v22  ;;  %v1435_v54 = vmul.f32 %v409_v0, %v1160_v8  ;;  %v1438_v40 = vmul.f32 %v409_v0, %v1173_v1  ;;  %v1441_v25 = vmul.f32 %v409_v0, %v1187_v51  ;;  %v1446_v38 = vpop.permute.xlu1 %413 }
 0x1a2   :  { %1673 = vst [vmem:[#allocation21_spill] sm:$0xff] %v1417_v34  ;;  %1675 = vst [vmem:[#allocation22_spill] sm:$0xff] %v1420_v58  ;;  %v1444_v7 = vmul.f32 %v409_v0, %v1686_v17  ;;  %v1449_v19 = vmul.f32 %v409_v0, %v1213_v24  ;;  %v1452_v36 = vmul.f32 %v409_v0, %v1224_v37  ;;  %v602_v34 = vld [vmem:[#allocation5 + $0xa8] sm:$0xff] }
 0x1a3   :  { %1677 = vst [vmem:[#allocation23_spill] sm:$0xff] %v1423_v14  ;;  %1679 = vst [vmem:[#allocation24_spill] sm:$0xff] %v1426_v28  ;;  %v1455_v8 = vmul.f32 %v409_v0, %v1237_v33  ;;  %v1458_v1 = vmul.f32 %v409_v0, %v1252_v20  ;;  %v1461_v51 = vmul.f32 %v409_v0, %v1261_v3  ;;  %v1698_v33 = vld [vmem:[#allocation11_spill] sm:$0xff]  ;;  %v1700_v20 = vld [vmem:[#allocation12_spill] sm:$0xff] }
 0x1a4   :  { %1681 = vst [vmem:[#allocation25_spill] sm:$0xff] %v1429_v55  ;;  %1682 = vst [vmem:[#allocation26_spill] sm:$0xff] %v1432_v61  ;;  %v1464_v6 = vmul.f32 %v409_v0, %v1270_v46  ;;  %v1467_v57 = vmul.f32 %v409_v0, %v1279_v52  ;;  %v1470_v24 = vmul.f32 %v409_v0, %v1288_v62  ;;  %v599_v61 = vld [vmem:[#allocation5 + $0x90] sm:$0xff]  ;;  %v600_v55 = vld [vmem:[#allocation5 + $0x98] sm:$0xff] }
 0x1a5   :  { %1683 = vst [vmem:[#allocation31_spill] sm:$0xff] %v1435_v54  ;;  %1684 = vst [vmem:[#allocation32_spill] sm:$0xff] %v1438_v40  ;;  %v1473_v37 = vmul.f32 %v409_v0, %v1285_v42  ;;  %v1477_v41 = vmul.f32 %v1446_v38, %v1698_v33  ;;  %v1481_v3 = vmul.f32 %v1446_v38, %v1700_v20  ;;  %v494_v52 = vpop.permute.xlu1 %493  ;;  %v1708_v0 = vld [vmem:[#allocation16_spill] sm:$0xff]  ;;  %v1710_v33 = vld [vmem:[#allocation17_spill] sm:$0xff] }
 0x1a6   :  { %1685 = vst [vmem:[#allocation33_spill] sm:$0xff] %v1441_v25  ;;  %1687 = vst [vmem:[#allocation30_spill] sm:$0xff] %v1444_v7  ;;  %v1485_v46 = vmul.f32 %v1446_v38, %v1702_v44  ;;  %v1489_v62 = vmul.f32 %v1446_v38, %v1704_v35  ;;  %v1493_v42 = vmul.f32 %v1446_v38, %v1706_v30  ;;  %v583_v30 = vld [vmem:[#allocation5 + $0x10] sm:$0xff]  ;;  %v596_v25 = vld [vmem:[#allocation5 + $0x78] sm:$0xff] }
 0x1a7   :  { %1688 = vst [vmem:[#allocation34_spill] sm:$0xff] %v1446_v38  ;;  %1689 = vst [vmem:[#allocation35_spill] sm:$0xff] %v1449_v19  ;;  %v1497_v17 = vmul.f32 %v1446_v38, %v1708_v0  ;;  %v1501_v20 = vmul.f32 %v1446_v38, %v1710_v33  ;;  %v507_v44 = vadd.f32 %v494_v52, %v417_v47  ;;  %v586_v47 = vld [vmem:[#allocation5 + $0x28] sm:$0xff]  ;;  %v595_v7 = vld [vmem:[#allocation5 + $0x70] sm:$0xff] }
 0x1a8   :  { %1690 = vst [vmem:[#allocation36_spill] sm:$0xff] %v1452_v36  ;;  %1691 = vst [vmem:[#allocation37_spill] sm:$0xff] %v1455_v8  ;;  %v510_v35 = vadd.f32 %v494_v52, %v420_v45  ;;  %v514_v0 = vadd.f32 %v494_v52, %v1348_v32  ;;  %v516_v33 = vadd.f32 %v494_v52, %v1354_v15  ;;  %v590_v38 = vld [vmem:[#allocation5 + $0x48] sm:$0xff]  ;;  %v591_v32 = vld [vmem:[#allocation5 + $0x50] sm:$0xff] }
 0x1a9   :  { %1692 = vst [vmem:[#allocation38_spill] sm:$0xff] %v1458_v1  ;;  %1693 = vst [vmem:[#allocation39_spill] sm:$0xff] %v1461_v51  ;;  %v585_v51 = vld [vmem:[#allocation5 + $0x20] sm:$0xff]  ;;  %v519_v45 = vadd.f32 %v494_v52, %v1363_v21  ;;  %v523_v15 = vadd.f32 %v494_v52, %v1375_v48  ;;  %v525_v1 = vadd.f32 %v494_v52, %v1381_v12  ;;  %v592_v8 = vld [vmem:[#allocation5 + $0x58] sm:$0xff] }
 0x1aa   :  { %1694 = vst [vmem:[#allocation40_spill] sm:$0xff] %v1464_v6  ;;  %1695 = vst [vmem:[#allocation41_spill] sm:$0xff] %v1467_v57  ;;  %v512_v57 = vadd.f32 %v494_v52, %v422_v53  ;;  %v513_v6 = vadd.f32 %v494_v52, %v423_v10  ;;  %v521_v53 = vadd.f32 %v494_v52, %v1369_v31  ;;  %v589_v10 = vld [vmem:[#allocation5 + $0x40] sm:$0xff]  ;;  %v598_v12 = vld [vmem:[#allocation5 + $0x88] sm:$0xff] }
 0x1ab   :  { %1696 = vst [vmem:[#allocation42_spill] sm:$0xff] %v1470_v24  ;;  %1697 = vst [vmem:[#allocation43_spill] sm:$0xff] %v1473_v37  ;;  %v581_v37 = vld [vmem:[#allocation5] sm:$0xff]  ;;  %v582_v24 = vld [vmem:[#allocation5 + $0x8] sm:$0xff]  ;;  %v526_v21 = vadd.f32 %v494_v52, %v1384_v29  ;;  %v528_v31 = vadd.f32 %v494_v52, %v1390_v60  ;;  %v529_v19 = vadd.f32 %v494_v52, %v1393_v23 }
 0x1ac   :  { %1699 = vst [vmem:[#allocation11_spill] sm:$0xff] %v1477_v41  ;;  %1701 = vst [vmem:[#allocation12_spill] sm:$0xff] %v1481_v3  ;;  %v506_v3 = vadd.f32 %v494_v52, %v416_v56  ;;  %v509_v41 = vadd.f32 %v494_v52, %v419_v5  ;;  %v517_v56 = vadd.f32 %v494_v52, %v1357_v16  ;;  %v588_v5 = vld [vmem:[#allocation5 + $0x38] sm:$0xff]  ;;  %v593_v36 = vld [vmem:[#allocation5 + $0x60] sm:$0xff] }
 0x1ad   :  { %1703 = vst [vmem:[#allocation13_spill] sm:$0xff] %v1485_v46  ;;  %1705 = vst [vmem:[#allocation14_spill] sm:$0xff] %v1489_v62  ;;  %v508_v46 = vadd.f32 %v494_v52, %v418_v2  ;;  %v511_v62 = vadd.f32 %v494_v52, %v421_v11  ;;  %v587_v2 = vld [vmem:[#allocation5 + $0x30] sm:$0xff]  ;;  %v520_v11 = vadd.f32 %v494_v52, %v1366_v27 }
 0x1ae   :  { %1707 = vst [vmem:[#allocation15_spill] sm:$0xff] %v1493_v42  ;;  %1709 = vst [vmem:[#allocation16_spill] sm:$0xff] %v1497_v17  ;;  %v584_v42 = vld [vmem:[#allocation5 + $0x18] sm:$0xff]  ;;  %v515_v17 = vadd.f32 %v494_v52, %v1351_v9  ;;  %v522_v9 = vadd.f32 %v494_v52, %v1372_v39  ;;  %v524_v16 = vadd.f32 %v494_v52, %v1378_v59  ;;  %v597_v39 = vld [vmem:[#allocation5 + $0x80] sm:$0xff] }
 0x1af   :  { %1711 = vst [vmem:[#allocation17_spill] sm:$0xff] %v1501_v20  ;;  %v518_v20 = vadd.f32 %v494_v52, %v1360_v18  ;;  %v594_v18 = vld [vmem:[#allocation5 + $0x68] sm:$0xff]  ;;  %v527_v27 = vadd.f32 %v494_v52, %v1387_v43  ;;  %v530_v48 = vadd.f32 %v494_v52, %v1396_v4  ;;  %v656_v40 = vadd.f32 %v581_v37, %v506_v3  ;;  %v601_v43 = vld [vmem:[#allocation5 + $0xa0] sm:$0xff]  ;;  %v603_v60 = vld [vmem:[#allocation5 + $0xb0] sm:$0xff] }
 0x1b0   :  { %v657_v59 = vadd.f32 %v582_v24, %v507_v44  ;;  %v658_v54 = vadd.f32 %v583_v30, %v508_v46  ;;  %v659_v28 = vadd.f32 %v584_v42, %v509_v41  ;;  %v660_v14 = vadd.f32 %v585_v51, %v510_v35  ;;  %v604_v4 = vld [vmem:[#allocation5 + $0xb8] sm:$0xff]  ;;  %v605_v24 = vld [vmem:[#allocation5 + $0xc0] sm:$0xff]  ;;  %v1520_v51 = vpop.permute.xlu1 %498 }
 0x1b1   :  { %v661_v29 = vadd.f32 %v586_v47, %v511_v62  ;;  %v662_v58 = vadd.f32 %v587_v2, %v512_v57  ;;  %v663_v22 = vadd.f32 %v588_v5, %v513_v6  ;;  %v664_v23 = vadd.f32 %v589_v10, %v514_v0  ;;  %731 = vst [vmem:[#allocation7] sm:$0xff] %v656_v40  ;;  %v1715_v62 = vld [vmem:[#allocation21_spill] sm:$0xff]  ;;  %v1718_v35 = vld [vmem:[#allocation24_spill] sm:$0xff]  ;;  %v610_v0 = vld [vmem:[#allocation5 + $0xe8] sm:$0xff] }
 0x1b2   :  { %v665_v63 = vadd.f32 %v590_v38, %v515_v17  ;;  %v666_v50 = vadd.f32 %v591_v32, %v516_v33  ;;  %732 = vst [vmem:[#allocation7 + $0x8] sm:$0xff] %v657_v59  ;;  %733 = vst [vmem:[#allocation7 + $0x10] sm:$0xff] %v658_v54  ;;  %v667_v37 = vadd.f32 %v592_v8, %v517_v56  ;;  %v1716_v17 = vld [vmem:[#allocation22_spill] sm:$0xff]  ;;  %v611_v33 = vld [vmem:[#allocation5 + $0xf0] sm:$0xff] }
 0x1b3   :  { %v668_v3 = vadd.f32 %v593_v36, %v518_v20  ;;  %v669_v46 = vadd.f32 %v594_v18, %v519_v45  ;;  %v670_v52 = vadd.f32 %v595_v7, %v520_v11  ;;  %734 = vst [vmem:[#allocation7 + $0x18] sm:$0xff] %v659_v28  ;;  %735 = vst [vmem:[#allocation7 + $0x20] sm:$0xff] %v660_v14  ;;  %v1712_v28 = vld [vmem:[#allocation18_spill] sm:$0xff]  ;;  %v1714_v7 = vld [vmem:[#allocation20_spill] sm:$0xff] }
 0x1b4   :  { %736 = vst [vmem:[#allocation7 + $0x28] sm:$0xff] %v661_v29  ;;  %737 = vst [vmem:[#allocation7 + $0x30] sm:$0xff] %v662_v58  ;;  %v671_v57 = vadd.f32 %v596_v25, %v521_v53  ;;  %v672_v6 = vadd.f32 %v597_v39, %v522_v9  ;;  %v673_v41 = vadd.f32 %v598_v12, %v523_v15  ;;  %v1717_v20 = vld [vmem:[#allocation23_spill] sm:$0xff]  ;;  %v612_v56 = vld [vmem:[#allocation5 + $0xf8] sm:$0xff] }
 0x1b5   :  { %v674_v38 = vadd.f32 %v599_v61, %v524_v16  ;;  %738 = vst [vmem:[#allocation7 + $0x38] sm:$0xff] %v663_v22  ;;  %739 = vst [vmem:[#allocation7 + $0x40] sm:$0xff] %v664_v23  ;;  %v675_v54 = vadd.f32 %v600_v55, %v525_v1  ;;  %v676_v40 = vadd.f32 %v601_v43, %v526_v21  ;;  %v1713_v61 = vld [vmem:[#allocation19_spill] sm:$0xff]  ;;  %v609_v1 = vld [vmem:[#allocation5 + $0xe0] sm:$0xff] }
 0x1b6   :  { %740 = vst [vmem:[#allocation7 + $0x48] sm:$0xff] %v665_v63  ;;  %741 = vst [vmem:[#allocation7 + $0x50] sm:$0xff] %v666_v50  ;;  %v677_v8 = vadd.f32 %v602_v34, %v527_v27  ;;  %v678_v36 = vadd.f32 %v603_v60, %v528_v31  ;;  %v679_v14 = vadd.f32 %v604_v4, %v529_v19  ;;  %v606_v63 = vld [vmem:[#allocation5 + $0xc8] sm:$0xff]  ;;  %v608_v19 = vld [vmem:[#allocation5 + $0xd8] sm:$0xff] }
 0x1b7   :  { %742 = vst [vmem:[#allocation7 + $0x58] sm:$0xff] %v667_v37  ;;  %743 = vst [vmem:[#allocation7 + $0x60] sm:$0xff] %v668_v3  ;;  %v680_v58 = vadd.f32 %v605_v24, %v530_v48  ;;  %v531_v22 = vadd.f32 %v1520_v51, %v1399_v49  ;;  %v532_v50 = vadd.f32 %v1520_v51, %v1402_v13  ;;  %v607_v13 = vld [vmem:[#allocation5 + $0xd0] sm:$0xff]  ;;  %v1719_v47 = vld [vmem:[#allocation25_spill] sm:$0xff] }
 0x1b8   :  { %744 = vst [vmem:[#allocation7 + $0x68] sm:$0xff] %v669_v46  ;;  %745 = vst [vmem:[#allocation7 + $0x70] sm:$0xff] %v670_v52  ;;  %v533_v34 = vadd.f32 %v1520_v51, %v1405_v26  ;;  %v534_v55 = vadd.f32 %v1520_v51, %v1712_v28  ;;  %v535_v25 = vadd.f32 %v1520_v51, %v1713_v61  ;;  %v1720_v5 = vld [vmem:[#allocation26_spill] sm:$0xff]  ;;  %v1721_v11 = vld [vmem:[#allocation31_spill] sm:$0xff] }
 0x1b9   :  { %746 = vst [vmem:[#allocation7 + $0x78] sm:$0xff] %v671_v57  ;;  %747 = vst [vmem:[#allocation7 + $0x80] sm:$0xff] %v672_v6  ;;  %v536_v49 = vadd.f32 %v1520_v51, %v1714_v7  ;;  %v537_v42 = vadd.f32 %v1520_v51, %v1715_v62  ;;  %v538_v26 = vadd.f32 %v1520_v51, %v1716_v17  ;;  %v1722_v10 = vld [vmem:[#allocation32_spill] sm:$0xff]  ;;  %v613_v9 = vld [vmem:[#allocation5 + $0x100] sm:$0xff] }
 0x1ba   :  { %748 = vst [vmem:[#allocation7 + $0x88] sm:$0xff] %v673_v41  ;;  %749 = vst [vmem:[#allocation7 + $0x90] sm:$0xff] %v674_v38  ;;  %v539_v44 = vadd.f32 %v1520_v51, %v1717_v20  ;;  %v540_v30 = vadd.f32 %v1520_v51, %v1718_v35  ;;  %v541_v2 = vadd.f32 %v1520_v51, %v1719_v47  ;;  %v614_v15 = vld [vmem:[#allocation5 + $0x108] sm:$0xff]  ;;  %v615_v16 = vld [vmem:[#allocation5 + $0x110] sm:$0xff] }
 0x1bb   :  { %750 = vst [vmem:[#allocation7 + $0x98] sm:$0xff] %v675_v54  ;;  %751 = vst [vmem:[#allocation7 + $0xa0] sm:$0xff] %v676_v40  ;;  %v542_v45 = vadd.f32 %v1520_v51, %v1720_v5  ;;  %v543_v53 = vadd.f32 %v1520_v51, %v1721_v11  ;;  %v544_v32 = vadd.f32 %v1520_v51, %v1722_v10  ;;  %v1723_v18 = vld [vmem:[#allocation33_spill] sm:$0xff]  ;;  %v1724_v27 = vld [vmem:[#allocation30_spill] sm:$0xff] }
 0x1bc   :  { %752 = vst [vmem:[#allocation7 + $0xa8] sm:$0xff] %v677_v8  ;;  %753 = vst [vmem:[#allocation7 + $0xb0] sm:$0xff] %v678_v36  ;;  %v545_v21 = vadd.f32 %v1520_v51, %v1723_v18  ;;  %v546_v31 = vadd.f32 %v1520_v51, %v1724_v27  ;;  %v1725_v39 = vld [vmem:[#allocation35_spill] sm:$0xff]  ;;  %v1726_v59 = vld [vmem:[#allocation36_spill] sm:$0xff]  ;;  %v681_v28 = vadd.f32 %v606_v63, %v531_v22 }
 0x1bd   :  { %754 = vst [vmem:[#allocation7 + $0xb8] sm:$0xff] %v679_v14  ;;  %755 = vst.msk [vmem:[#allocation7 + $0xc0] sm:$0xff] %vm144_vm0, %v680_v58  ;;  %v547_v48 = vadd.f32 %v1520_v51, %v1725_v39  ;;  %v548_v12 = vadd.f32 %v1520_v51, %v1726_v59  ;;  %v616_v29 = vld [vmem:[#allocation5 + $0x118] sm:$0xff]  ;;  %v617_v43 = vld [vmem:[#allocation5 + $0x120] sm:$0xff]  ;;  %v682_v17 = vadd.f32 %v607_v13, %v532_v50 }
 0x1be   :  { %v618_v60 = vld [vmem:[#allocation5 + $0x128] sm:$0xff]  ;;  %v1727_v23 = vld [vmem:[#allocation37_spill] sm:$0xff]  ;;  %v1729_v3 = vld [vmem:[#allocation39_spill] sm:$0xff]  ;;  %v683_v20 = vadd.f32 %v608_v19, %v533_v34  ;;  %v684_v35 = vadd.f32 %v609_v1, %v534_v55  ;;  %v685_v47 = vadd.f32 %v610_v0, %v535_v25  ;;  %v686_v18 = vadd.f32 %v611_v33, %v536_v49  ;;  %756 = vst [vmem:[#allocation7 + $0xc8] sm:$0xff] %v681_v28 }
 0x1bf   :  { %v549_v4 = vadd.f32 %v1520_v51, %v1727_v23  ;;  %v1728_v24 = vld [vmem:[#allocation38_spill] sm:$0xff]  ;;  %v551_v46 = vadd.f32 %v1520_v51, %v1729_v3  ;;  %v1730_v52 = vld [vmem:[#allocation40_spill] sm:$0xff]  ;;  %v619_v6 = vld [vmem:[#allocation5 + $0x130] sm:$0xff]  ;;  %v687_v27 = vadd.f32 %v612_v56, %v537_v42  ;;  %v688_v39 = vadd.f32 %v613_v9, %v538_v26  ;;  %757 = vst [vmem:[#allocation7 + $0xd0] sm:$0xff] %v682_v17 }
 0x1c0   :  { %v550_v37 = vadd.f32 %v1520_v51, %v1728_v24  ;;  %v552_v57 = vadd.f32 %v1520_v51, %v1730_v52  ;;  %v620_v41 = vld [vmem:[#allocation5 + $0x138] sm:$0xff]  ;;  %v621_v38 = vld [vmem:[#allocation5 + $0x140] sm:$0xff]  ;;  %v1732_v8 = vld [vmem:[#allocation42_spill] sm:$0xff]  ;;  %v689_v59 = vadd.f32 %v614_v15, %v539_v44  ;;  %v691_v22 = vadd.f32 %v616_v29, %v541_v2  ;;  %758 = vst [vmem:[#allocation7 + $0xd8] sm:$0xff] %v683_v20 }
 0x1c1   :  { %v1731_v54 = vld [vmem:[#allocation41_spill] sm:$0xff]  ;;  %v554_v36 = vadd.f32 %v1520_v51, %v1732_v8  ;;  %v1733_v14 = vld [vmem:[#allocation43_spill] sm:$0xff]  ;;  %v622_v61 = vld [vmem:[#allocation5 + $0x148] sm:$0xff]  ;;  %v692_v63 = vadd.f32 %v617_v43, %v542_v45  ;;  %v693_v52 = vadd.f32 %v618_v60, %v543_v53  ;;  %759 = vst [vmem:[#allocation7 + $0xe0] sm:$0xff] %v684_v35  ;;  %v694_v50 = vadd.f32 %v619_v6, %v544_v32 }
 0x1c2   :  { %v553_v40 = vadd.f32 %v1520_v51, %v1731_v54  ;;  %v555_v58 = vadd.f32 %v1520_v51, %v1733_v14  ;;  %v623_v7 = vld [vmem:[#allocation5 + $0x150] sm:$0xff]  ;;  %v624_v62 = vld [vmem:[#allocation5 + $0x158] sm:$0xff]  ;;  %v625_v5 = vld [vmem:[#allocation5 + $0x160] sm:$0xff]  ;;  %v690_v51 = vadd.f32 %v615_v16, %v540_v30  ;;  %760 = vst [vmem:[#allocation7 + $0xe8] sm:$0xff] %v685_v47  ;;  %v695_v34 = vadd.f32 %v620_v41, %v545_v21 }
 0x1c3   :  { %v626_v11 = vld [vmem:[#allocation5 + $0x168] sm:$0xff]  ;;  %v627_v10 = vld [vmem:[#allocation5 + $0x170] sm:$0xff]  ;;  %v628_v23 = vld [vmem:[#allocation5 + $0x178] sm:$0xff]  ;;  %v696_v55 = vadd.f32 %v621_v38, %v546_v31  ;;  %v697_v25 = vadd.f32 %v622_v61, %v547_v48  ;;  %761 = vst [vmem:[#allocation7 + $0xf0] sm:$0xff] %v686_v18  ;;  %v698_v49 = vadd.f32 %v623_v7, %v548_v12  ;;  %v699_v13 = vadd.f32 %v624_v62, %v549_v4  ;;  %v504_v4 = vpop.permute.xlu1 %503 }
 0x1c4   :  { %v629_v24 = vld [vmem:[#allocation5 + $0x180] sm:$0xff]  ;;  %v630_v3 = vld [vmem:[#allocation5 + $0x188] sm:$0xff]  ;;  %762 = vst [vmem:[#allocation7 + $0xf8] sm:$0xff] %v687_v27  ;;  %763 = vst [vmem:[#allocation7 + $0x100] sm:$0xff] %v688_v39  ;;  %v700_v19 = vadd.f32 %v625_v5, %v550_v37  ;;  %v701_v1 = vadd.f32 %v626_v11, %v551_v46  ;;  %v702_v42 = vadd.f32 %v627_v10, %v552_v57 }
 0x1c5   :  { %764 = vst [vmem:[#allocation7 + $0x108] sm:$0xff] %v689_v59  ;;  %765 = vst [vmem:[#allocation7 + $0x110] sm:$0xff] %v690_v51  ;;  %v703_v26 = vadd.f32 %v628_v23, %v553_v40  ;;  %v704_v44 = vadd.f32 %v629_v24, %v554_v36  ;;  %v705_v30 = vadd.f32 %v630_v3, %v555_v58  ;;  %v838_v0 = vld [vmem:[#allocation2 + $0x1c8] sm:$0xff]  ;;  %v1734_v33 = vld [vmem:[#allocation34_spill] sm:$0xff] }
 0x1c6   :  { %766 = vst [vmem:[#allocation7 + $0x118] sm:$0xff] %v691_v22  ;;  %767 = vst [vmem:[#allocation7 + $0x120] sm:$0xff] %v692_v63  ;;  %v473_v56 = vmul.f32 %v838_v0, %v1734_v33  ;;  %v839_v2 = vld [vmem:[#allocation2 + $0x1d0] sm:$0xff]  ;;  %v840_v53 = vld [vmem:[#allocation2 + $0x1d8] sm:$0xff] }
 0x1c7   :  { %768 = vst [vmem:[#allocation7 + $0x128] sm:$0xff] %v693_v52  ;;  %769 = vst [vmem:[#allocation7 + $0x130] sm:$0xff] %v694_v50  ;;  %v474_v45 = vmul.f32 %v839_v2, %v1734_v33  ;;  %v475_v32 = vmul.f32 %v840_v53, %v1734_v33  ;;  %v841_v9 = vld [vmem:[#allocation2 + $0x1e0] sm:$0xff]  ;;  %v842_v16 = vld [vmem:[#allocation2 + $0x1e8] sm:$0xff] }
 0x1c8   :  { %770 = vst [vmem:[#allocation7 + $0x138] sm:$0xff] %v695_v34  ;;  %771 = vst [vmem:[#allocation7 + $0x140] sm:$0xff] %v696_v55  ;;  %v476_v15 = vmul.f32 %v841_v9, %v1734_v33  ;;  %v477_v21 = vmul.f32 %v842_v16, %v1734_v33  ;;  %v843_v31 = vld [vmem:[#allocation2 + $0x1f0] sm:$0xff]  ;;  %v844_v12 = vld [vmem:[#allocation2 + $0x1f8] sm:$0xff] }
 0x1c9   :  { %772 = vst [vmem:[#allocation7 + $0x148] sm:$0xff] %v697_v25  ;;  %773 = vst [vmem:[#allocation7 + $0x150] sm:$0xff] %v698_v49  ;;  %v478_v48 = vmul.f32 %v843_v31, %v1734_v33  ;;  %v479_v29 = vmul.f32 %v844_v12, %v1734_v33  ;;  %v845_v43 = vld [vmem:[#allocation2 + $0x200] sm:$0xff]  ;;  %v846_v37 = vld [vmem:[#allocation2 + $0x208] sm:$0xff]  ;;  %v563_v49 = vadd.f32 %v504_v4, %v473_v56 }
 0x1ca   :  { %774 = vst [vmem:[#allocation7 + $0x158] sm:$0xff] %v699_v13  ;;  %775 = vst [vmem:[#allocation7 + $0x160] sm:$0xff] %v700_v19  ;;  %v480_v60 = vmul.f32 %v845_v43, %v1734_v33  ;;  %v481_v46 = vmul.f32 %v846_v37, %v1734_v33  ;;  %v847_v57 = vld [vmem:[#allocation2 + $0x210] sm:$0xff]  ;;  %v848_v41 = vld [vmem:[#allocation2 + $0x218] sm:$0xff]  ;;  %v564_v13 = vadd.f32 %v504_v4, %v474_v45 }
 0x1cb   :  { %776 = vst [vmem:[#allocation7 + $0x168] sm:$0xff] %v701_v1  ;;  %777 = vst [vmem:[#allocation7 + $0x170] sm:$0xff] %v702_v42  ;;  %v482_v6 = vmul.f32 %v847_v57, %v1734_v33  ;;  %v483_v38 = vmul.f32 %v848_v41, %v1734_v33  ;;  %v849_v54 = vld [vmem:[#allocation2 + $0x220] sm:$0xff]  ;;  %v850_v8 = vld [vmem:[#allocation2 + $0x228] sm:$0xff]  ;;  %v565_v19 = vadd.f32 %v504_v4, %v475_v32 }
 0x1cc   :  { %778 = vst [vmem:[#allocation7 + $0x178] sm:$0xff] %v703_v26  ;;  %779 = vst [vmem:[#allocation7 + $0x180] sm:$0xff] %v704_v44  ;;  %v484_v40 = vmul.f32 %v849_v54, %v1734_v33  ;;  %v485_v36 = vmul.f32 %v850_v8, %v1734_v33  ;;  %v851_v14 = vld [vmem:[#allocation2 + $0x230] sm:$0xff]  ;;  %v1735_v28 = vld [vmem:[#allocation27_spill] sm:$0xff]  ;;  %v566_v44 = vadd.f32 %v504_v4, %v476_v15 }
 0x1cd   :  { %780 = vst.msk [vmem:[#allocation7 + $0x188] sm:$0xff] %vm144_vm0, %v705_v30  ;;  %v486_v58 = vmul.f32 %v851_v14, %v1734_v33  ;;  %v487_v61 = vmul.f32 %v1734_v33, %v1735_v28  ;;  %v1736_v7 = vld [vmem:[#allocation28_spill] sm:$0xff]  ;;  %v1737_v17 = vld [vmem:[#allocation29_spill] sm:$0xff]  ;;  %v1738_v5 = vld [vmem:[#allocation11_spill] sm:$0xff]  ;;  %v567_v30 = vadd.f32 %v504_v4, %v477_v21  ;;  %v568_v0 = vadd.f32 %v504_v4, %v478_v48 }
 0x1ce   :  { %v488_v62 = vmul.f32 %v1734_v33, %v1736_v7  ;;  %v489_v20 = vmul.f32 %v1734_v33, %v1737_v17  ;;  %v852_v35 = vld [vmem:[#allocation2 + $0x250] sm:$0xff]  ;;  %v556_v11 = vadd.f32 %v504_v4, %v1738_v5  ;;  %v631_v27 = vld [vmem:[#allocation5 + $0x190] sm:$0xff]  ;;  %v1740_v39 = vld [vmem:[#allocation13_spill] sm:$0xff]  ;;  %v570_v16 = vadd.f32 %v504_v4, %v480_v60 }
 0x1cf   :  { %v490_v47 = vmul.f32 %v852_v35, %v1734_v33  ;;  %v1739_v10 = vld [vmem:[#allocation12_spill] sm:$0xff]  ;;  %v558_v59 = vadd.f32 %v504_v4, %v1740_v39  ;;  %v1741_v23 = vld [vmem:[#allocation14_spill] sm:$0xff]  ;;  %v1742_v3 = vld [vmem:[#allocation15_spill] sm:$0xff]  ;;  %v569_v33 = vadd.f32 %v504_v4, %v479_v29  ;;  %v571_v31 = vadd.f32 %v504_v4, %v481_v46 }
 0x1d0   :  { %v557_v18 = vadd.f32 %v504_v4, %v1739_v10  ;;  %v559_v24 = vadd.f32 %v504_v4, %v1741_v23  ;;  %v560_v51 = vadd.f32 %v504_v4, %v1742_v3  ;;  %v1743_v22 = vld [vmem:[#allocation16_spill] sm:$0xff]  ;;  %v633_v50 = vld [vmem:[#allocation5 + $0x1a0] sm:$0xff]  ;;  %v634_v34 = vld [vmem:[#allocation5 + $0x1a8] sm:$0xff]  ;;  %v572_v12 = vadd.f32 %v504_v4, %v482_v6 }
 0x1d1   :  { %v561_v63 = vadd.f32 %v504_v4, %v1743_v22  ;;  %v632_v52 = vld [vmem:[#allocation5 + $0x198] sm:$0xff]  ;;  %v1744_v55 = vld [vmem:[#allocation17_spill] sm:$0xff]  ;;  %v635_v1 = vld [vmem:[#allocation5 + $0x1b0] sm:$0xff]  ;;  %v573_v43 = vadd.f32 %v504_v4, %v483_v38  ;;  %v574_v56 = vadd.f32 %v504_v4, %v484_v40  ;;  %v575_v45 = vadd.f32 %v504_v4, %v485_v36 }
 0x1d2   :  { %v562_v25 = vadd.f32 %v504_v4, %v1744_v55  ;;  %v636_v42 = vld [vmem:[#allocation5 + $0x1b8] sm:$0xff]  ;;  %v637_v26 = vld [vmem:[#allocation5 + $0x1c0] sm:$0xff]  ;;  %v638_v2 = vld [vmem:[#allocation5 + $0x1c8] sm:$0xff]  ;;  %v576_v32 = vadd.f32 %v504_v4, %v486_v58  ;;  %v577_v54 = vadd.f32 %v504_v4, %v487_v61  ;;  %v578_v21 = vadd.f32 %v504_v4, %v488_v62 }
 0x1d3   :  { %v639_v53 = vld [vmem:[#allocation5 + $0x1d0] sm:$0xff]  ;;  %v640_v9 = vld [vmem:[#allocation5 + $0x1d8] sm:$0xff]  ;;  %v641_v37 = vld [vmem:[#allocation5 + $0x1e0] sm:$0xff]  ;;  %v579_v48 = vadd.f32 %v504_v4, %v489_v20  ;;  %v580_v29 = vadd.f32 %v504_v4, %v490_v47  ;;  %v706_v28 = vadd.f32 %v631_v27, %v556_v11  ;;  %v707_v46 = vadd.f32 %v632_v52, %v557_v18 }
 0x1d4   :  { %v642_v57 = vld [vmem:[#allocation5 + $0x1e8] sm:$0xff]  ;;  %v643_v41 = vld [vmem:[#allocation5 + $0x1f0] sm:$0xff]  ;;  %v644_v8 = vld [vmem:[#allocation5 + $0x1f8] sm:$0xff]  ;;  %v708_v6 = vadd.f32 %v633_v50, %v558_v59  ;;  %v709_v38 = vadd.f32 %v634_v34, %v559_v24  ;;  %v710_v35 = vadd.f32 %v635_v1, %v560_v51  ;;  %v711_v36 = vadd.f32 %v636_v42, %v561_v63 }
 0x1d5   :  { %v645_v14 = vld [vmem:[#allocation5 + $0x200] sm:$0xff]  ;;  %v646_v15 = vld [vmem:[#allocation5 + $0x208] sm:$0xff]  ;;  %v647_v7 = vld [vmem:[#allocation5 + $0x210] sm:$0xff]  ;;  %v712_v58 = vadd.f32 %v637_v26, %v562_v25  ;;  %v713_v61 = vadd.f32 %v638_v2, %v563_v49  ;;  %v714_v39 = vadd.f32 %v639_v53, %v564_v13  ;;  %781 = vst [vmem:[#allocation7 + $0x190] sm:$0xff] %v706_v28  ;;  %v715_v4 = vadd.f32 %v640_v9, %v565_v19 }
 0x1d6   :  { %v648_v17 = vld [vmem:[#allocation5 + $0x218] sm:$0xff]  ;;  %v649_v60 = vld [vmem:[#allocation5 + $0x220] sm:$0xff]  ;;  %v650_v5 = vld [vmem:[#allocation5 + $0x228] sm:$0xff]  ;;  %v716_v47 = vadd.f32 %v641_v37, %v566_v44  ;;  %v717_v11 = vadd.f32 %v642_v57, %v567_v30  ;;  %v718_v27 = vadd.f32 %v643_v41, %v568_v0  ;;  %782 = vst [vmem:[#allocation7 + $0x198] sm:$0xff] %v707_v46  ;;  %v719_v18 = vadd.f32 %v644_v8, %v569_v33 }
 0x1d7   :  { %v651_v10 = vld [vmem:[#allocation5 + $0x230] sm:$0xff]  ;;  %v652_v40 = vld [vmem:[#allocation5 + $0x238] sm:$0xff]  ;;  %v653_v23 = vld [vmem:[#allocation5 + $0x240] sm:$0xff]  ;;  %783 = vst [vmem:[#allocation7 + $0x1a0] sm:$0xff] %v708_v6  ;;  %v720_v59 = vadd.f32 %v645_v14, %v570_v16  ;;  %v721_v24 = vadd.f32 %v646_v15, %v571_v31  ;;  %v722_v3 = vadd.f32 %v647_v7, %v572_v12  ;;  %v723_v51 = vadd.f32 %v648_v17, %v573_v43 }
 0x1d8   :  { %v654_v62 = vld [vmem:[#allocation5 + $0x248] sm:$0xff]  ;;  %v655_v20 = vld [vmem:[#allocation5 + $0x250] sm:$0xff]  ;;  %784 = vst [vmem:[#allocation7 + $0x1a8] sm:$0xff] %v709_v38  ;;  %785 = vst [vmem:[#allocation7 + $0x1b0] sm:$0xff] %v710_v35  ;;  %v724_v22 = vadd.f32 %v649_v60, %v574_v56  ;;  %v725_v63 = vadd.f32 %v650_v5, %v575_v45  ;;  %v726_v52 = vadd.f32 %v651_v10, %v576_v32 }
 0x1d9   :  { %786 = vst [vmem:[#allocation7 + $0x1b8] sm:$0xff] %v711_v36  ;;  %787 = vst [vmem:[#allocation7 + $0x1c0] sm:$0xff] %v712_v58  ;;  %v727_v50 = vadd.f32 %v652_v40, %v577_v54  ;;  %v728_v34 = vadd.f32 %v653_v23, %v578_v21  ;;  %v729_v55 = vadd.f32 %v654_v62, %v579_v48 }
 0x1da   :  { %788 = vst [vmem:[#allocation7 + $0x1c8] sm:$0xff] %v713_v61  ;;  %789 = vst [vmem:[#allocation7 + $0x1d0] sm:$0xff] %v714_v39  ;;  %v730_v25 = vadd.f32 %v655_v20, %v580_v29 }
 0x1db   :  { %790 = vst [vmem:[#allocation7 + $0x1d8] sm:$0xff] %v715_v4  ;;  %791 = vst [vmem:[#allocation7 + $0x1e0] sm:$0xff] %v716_v47 }
 0x1dc   :  { %792 = vst [vmem:[#allocation7 + $0x1e8] sm:$0xff] %v717_v11  ;;  %793 = vst [vmem:[#allocation7 + $0x1f0] sm:$0xff] %v718_v27 }
 0x1dd   :  { %794 = vst [vmem:[#allocation7 + $0x1f8] sm:$0xff] %v719_v18  ;;  %795 = vst [vmem:[#allocation7 + $0x200] sm:$0xff] %v720_v59 }
 0x1de   :  { %796 = vst [vmem:[#allocation7 + $0x208] sm:$0xff] %v721_v24  ;;  %797 = vst [vmem:[#allocation7 + $0x210] sm:$0xff] %v722_v3 }
 0x1df   :  { %798 = vst [vmem:[#allocation7 + $0x218] sm:$0xff] %v723_v51  ;;  %799 = vst [vmem:[#allocation7 + $0x220] sm:$0xff] %v724_v22 }
 0x1e0   :  { %800 = vst [vmem:[#allocation7 + $0x228] sm:$0xff] %v725_v63  ;;  %801 = vst [vmem:[#allocation7 + $0x230] sm:$0xff] %v726_v52 }
 0x1e1   :  { %802 = vst [vmem:[#allocation7 + $0x238] sm:$0xff] %v727_v50  ;;  %803 = vst [vmem:[#allocation7 + $0x240] sm:$0xff] %v728_v34 }
 0x1e2   :  { %804 = vst [vmem:[#allocation7 + $0x248] sm:$0xff] %v729_v55  ;;  %805 = vst.msk [vmem:[#allocation7 + $0x250] sm:$0xff] %vm144_vm0, %v730_v25 }
 0x1e3   :  { %908 = shalt.err (!%p905_p6)
}
 0x1e4   :  { %s909_s30 = scalar_lea.hbm %s1622_s4, 9600 }
 0x1e5   :  { %p910_p7 = scmp.ne.s32.totalorder %s1622_s4, %s909_s30  ;;  %p913_p8 = scmp.lt.u32.totalorder %s909_s30, %s1622_s4 }
 0x1e7   :  { %p915_p9 = pnand %p913_p8, %p910_p7 }
 0x1e9   :  { %918 = shalt.err (!%p915_p9)
}
 0x1ea   :  { %817 = dma.vmem_to_hbm [thread:$0]  %s812_s3, 9600, %s1622_s4, [#allocation4], %s926_s25, %s926_s25, %s927_s26  }
 0x1eb   :  { %923 = dma.done.wait [#allocation4], 9600  }
 0x1ec   :  { %924 = vsyncadd [#allocation4], 4294957696 }
 0x1ed   :  { %821 = vsyncpa [#allocation3], 1 }
 0x1ee   :  { %822 = vsyncpa [#allocation6], 1 }
 0x1ef   :  { %823 = vsyncpa [#allocation4], 1 }

</bundles_post_ra>
